<compile_context>
chip_gen: v6e
topology: v6e:2x2x1
jax: 0.10.0
libtpu: 0.0.40
codegen_flags: <defaults>
</compile_context>

<pallas_src>
import jax
import jax.numpy as jnp
from jax import lax
from jax.experimental import pallas as pl
from jax.experimental.pallas import tpu as pltpu

_VMEM_BUDGET = 32 * 1024 * 1024   # per-step working-set budget for fused-path selection


def _bernoulli_entropy_sample(logits, u):
    """Per-element Bernoulli(logits) entropy and sample (exact, numerically stable)."""
    m = -jnp.abs(logits)                         # m <= 0  ->  e = exp(m) in (0, 1]
    e = jnp.exp(m)
    denom = 1.0 + e
    p_m = e / denom                              # sigmoid(-|l|)
    ent_elem = jnp.log(denom) - m * p_m          # softplus(l) - l*sigmoid(l)
    p = jnp.where(logits >= 0.0, 1.0 - p_m, p_m)  # sigmoid(l), exact
    sample = (u < p).astype(jnp.float32)
    return ent_elem, sample


def _rowsum_to_lane(ent_elem):
    """(TB, K) -> (1, TB) row sums, produced directly in lane layout via a tiny MXU dot
    (avoids a sublane->lane relayout / transpose of a column vector)."""
    ones_row = jnp.ones((1, ent_elem.shape[1]), dtype=jnp.float32)
    return lax.dot_general(ones_row, ent_elem,
                           dimension_numbers=(((1,), (1,)), ((), ())),
                           preferred_element_type=jnp.float32)


# ---------------------------------------------------------------------------
# Fused path: 1-D grid over batch tiles, weight matrix resident in VMEM.
# ---------------------------------------------------------------------------
def _nvil_fused_kernel(x_ref, w_ref, b_ref, u_ref, sample_ref, scores_ref, ent_ref):
    x = x_ref[...].astype(jnp.bfloat16)          # in-kernel bf16 cast (f32 read from HBM)
    w = w_ref[...].astype(jnp.bfloat16)
    logits = jnp.dot(x, w, preferred_element_type=jnp.float32) + b_ref[...]
    scores_ref[...] = logits
    ent_elem, sample = _bernoulli_entropy_sample(logits, u_ref[...])
    sample_ref[...] = sample
    ent_ref[...] = _rowsum_to_lane(ent_elem)     # batch-in-lane entropy, (1, TB)


# ---------------------------------------------------------------------------
# Tiled path: 2-D grid (batch tiles x contraction tiles), f32 accumulator.
# ---------------------------------------------------------------------------
def _nvil_tiled_kernel(x_ref, w_ref, b_ref, u_ref,
                       sample_ref, scores_ref, ent_ref, acc_ref):
    k = pl.program_id(1)
    nk = pl.num_programs(1)

    @pl.when(k == 0)
    def _():
        # Bias folded into the accumulator init (saves a (TB, K) add in the epilogue).
        acc_ref[...] = jnp.broadcast_to(b_ref[...], acc_ref.shape)

    acc_ref[...] += jnp.dot(x_ref[...].astype(jnp.bfloat16),
                            w_ref[...].astype(jnp.bfloat16),
                            preferred_element_type=jnp.float32)

    @pl.when(k == nk - 1)
    def _():
        logits = acc_ref[...]
        scores_ref[...] = logits
        ent_elem, sample = _bernoulli_entropy_sample(logits, u_ref[...])
        sample_ref[...] = sample
        ent_ref[...] = _rowsum_to_lane(ent_elem)


# ---------------------------------------------------------------------------
# Wrapper
# ---------------------------------------------------------------------------
def _pick_batch_tile(B):
    return B if B <= 512 else 512            # full batch, or a multiple-of-8 tile


def _fused_footprint_bytes(tb, D, K):
    # f32 blocks, double-buffered inputs/outputs + bias/entropy slivers.
    return 8 * tb * D + 8 * D * K + 24 * tb * K + 8 * K + 16 * tb


def _tiled_footprint_bytes(tb, td, K):
    return 8 * tb * td + 8 * td * K + 28 * tb * K + 8 * K + 16 * tb


def _contraction_tiling(D, target=1024):
    """Return (TD, Dp): contraction tile and (possibly zero-padded) depth."""
    if D <= target:
        return D, D
    td0 = (target // 128) * 128
    for cand in range(td0, 127, -128):       # prefer an exact divisor near the target
        if D % cand == 0:
            return cand, D
    Dp = ((D + td0 - 1) // td0) * td0        # otherwise zero-pad (exact for the dot)
    return td0, Dp


def _compiler_params(semantics, footprint_bytes):
    # Derive the scoped-VMEM limit from the tile footprint; cap well under v7x's 64 MiB.
    limit = int(min(max(footprint_bytes + (16 << 20), 32 << 20), 48 << 20))
    return pltpu.CompilerParams(dimension_semantics=semantics,
                                vmem_limit_bytes=limit)


def bitvector_nvil_forward(image, w, b, key):
    """image: (B, C, H, W) f32; w: (D, K) f32; b: (K,) f32; key: jax PRNG key.

    Returns (sample, scores, entropy) matching BitVectorNVILWrapper.forward.
    """
    B = image.shape[0]
    D, K = w.shape

    x = image.reshape(B, D).astype(jnp.float32)      # == torch .view(-1, input_size)
    w = w.astype(jnp.float32)
    b2d = b.reshape(1, K).astype(jnp.float32)
    u = jax.random.uniform(key, (B, K), dtype=jnp.float32)

    TB = _pick_batch_tile(B)
    nb = pl.cdiv(B, TB)
    out_shapes = (
        jax.ShapeDtypeStruct((B, K), jnp.float32),   # sample
        jax.ShapeDtypeStruct((B, K), jnp.float32),   # scores (logits)
        jax.ShapeDtypeStruct((1, B), jnp.float32),   # entropy, batch-in-lane
    )

    fused_bytes = _fused_footprint_bytes(TB, D, K)
    if fused_bytes <= _VMEM_BUDGET:
        sample, scores, ent = pl.pallas_call(
            _nvil_fused_kernel,
            out_shape=out_shapes,
            grid=(nb,),
            in_specs=[
                pl.BlockSpec((TB, D), lambda i: (i, 0)),   # activations (f32, cast in-kernel)
                pl.BlockSpec((D, K), lambda i: (0, 0)),    # weight, VMEM-resident
                pl.BlockSpec((1, K), lambda i: (0, 0)),    # bias
                pl.BlockSpec((TB, K), lambda i: (i, 0)),   # uniforms for Bernoulli sample
            ],
            out_specs=(
                pl.BlockSpec((TB, K), lambda i: (i, 0)),
                pl.BlockSpec((TB, K), lambda i: (i, 0)),
                pl.BlockSpec((1, TB), lambda i: (0, i)),
            ),
            compiler_params=_compiler_params(("parallel",), fused_bytes),
        )(x, w, b2d, u)
    else:
        TD, Dp = _contraction_tiling(D)
        if Dp != D:                                  # zero-pad depth; exact for the dot
            x = jnp.pad(x, ((0, 0), (0, Dp - D)))
            w = jnp.pad(w, ((0, Dp - D), (0, 0)))
        nk = Dp // TD
        tiled_bytes = _tiled_footprint_bytes(TB, TD, K)
        sample, scores, ent = pl.pallas_call(
            _nvil_tiled_kernel,
            out_shape=out_shapes,
            grid=(nb, nk),
            in_specs=[
                pl.BlockSpec((TB, TD), lambda i, k: (i, k)),
                pl.BlockSpec((TD, K), lambda i, k: (k, 0)),
                pl.BlockSpec((1, K), lambda i, k: (0, 0)),
                pl.BlockSpec((TB, K), lambda i, k: (i, 0)),
            ],
            out_specs=(
                pl.BlockSpec((TB, K), lambda i, k: (i, 0)),
                pl.BlockSpec((TB, K), lambda i, k: (i, 0)),
                pl.BlockSpec((1, TB), lambda i, k: (0, i)),
            ),
            scratch_shapes=[pltpu.VMEM((TB, K), jnp.float32)],
            compiler_params=_compiler_params(("parallel", "arbitrary"), tiled_bytes),
        )(x, w, b2d, u)

    return sample, scores, ent[0]


if __name__ == "__main__":
    key = jax.random.PRNGKey(0)
    k_img, k_w, k_b, k_u = jax.random.split(key, 4)

    # Small shapes: batch=2, channels=4, spatial=16 -> input_size = 4*16*16 = 1024
    B, C, H, W = 2, 4, 16, 16
    D = C * H * W
    K = 128                                          # n_bits of the bit vector

    image = jax.random.normal(k_img, (B, C, H, W), dtype=jnp.float32)
    agent_w = jax.random.normal(k_w, (D, K), dtype=jnp.float32) * 0.02
    agent_b = jax.random.normal(k_b, (K,), dtype=jnp.float32) * 0.02
    # TODO(synk): BaselineNN is constructed in __init__ but never used by
    # BitVectorNVILWrapper.forward, so it is not computed here.

    sample, scores, entropy = bitvector_nvil_forward(image, agent_w, agent_b, k_u)
    jax.block_until_ready((sample, scores, entropy))

    assert sample.shape == (B, K)
    assert scores.shape == (B, K)
    assert entropy.shape == (B,)

    # Pure-JAX reference (f32). Tolerances absorb bf16 MXU rounding.
    x_f32 = image.reshape(B, D)
    ref_scores = x_f32 @ agent_w + agent_b
    p_ref = jax.nn.sigmoid(ref_scores)
    ref_ent = jnp.sum(jnp.logaddexp(ref_scores, 0.0) - ref_scores * p_ref, axis=1)
    assert jnp.allclose(scores, ref_scores, rtol=5e-2, atol=5e-2)
    assert jnp.allclose(entropy, ref_ent, rtol=5e-2, atol=5e-1)
    assert bool(jnp.all((sample == 0.0) | (sample == 1.0)))

    # Sample must equal (u < sigmoid(kernel logits)) up to sub-ulp sigmoid differences.
    u_chk = jax.random.uniform(k_u, (B, K), dtype=jnp.float32)
    expected_sample = (u_chk < jax.nn.sigmoid(scores)).astype(jnp.float32)
    assert float(jnp.mean(jnp.abs(sample - expected_sample))) <= 2.0 / (B * K)

    print("KERNEL_OK")
</pallas_src>

<mosaic_0001>
module attributes {stable_mosaic.version = 11 : i64} {
  func.func @_nvil_fused_kernel(%arg0: i32, %arg1: memref<2x1024xf32, #tpu.memory_space<vmem>>, %arg2: memref<1024x128xf32, #tpu.memory_space<vmem>>, %arg3: memref<1x128xf32, #tpu.memory_space<vmem>>, %arg4: memref<2x128xf32, #tpu.memory_space<vmem>>, %arg5: memref<2x128xf32, #tpu.memory_space<vmem>>, %arg6: memref<2x128xf32, #tpu.memory_space<vmem>>, %arg7: memref<1x2xf32, #tpu.memory_space<vmem>>) attributes {dimension_semantics = [#tpu.dimension_semantics<parallel>], iteration_bounds = array<i64: 1>, scalar_prefetch = 0 : i64, scratch_operands = 0 : i64, tpu.core_type = #tpu.core_type<tc>, window_params = [{transform_indices = @transform_0, window_bounds = array<i64: 2, 1024>}, {pipeline_mode = #tpu.pipeline_mode<synchronous>, transform_indices = @transform_1, window_bounds = array<i64: 1024, 128>}, {pipeline_mode = #tpu.pipeline_mode<synchronous>, transform_indices = @transform_2, window_bounds = array<i64: 1, 128>}, {transform_indices = @transform_3, window_bounds = array<i64: 2, 128>}, {transform_indices = @transform_4, window_bounds = array<i64: 2, 128>}, {transform_indices = @transform_5, window_bounds = array<i64: 2, 128>}, {transform_indices = @transform_6, window_bounds = array<i64: 1, 2>}]} {
    %c0 = arith.constant 0 : index
    %c0_0 = arith.constant 0 : index
    %0 = vector.load %arg1[%c0, %c0_0] : memref<2x1024xf32, #tpu.memory_space<vmem>>, vector<2x1024xf32>
    %1 = arith.truncf %0 : vector<2x1024xf32> to vector<2x1024xbf16>
    %c0_1 = arith.constant 0 : index
    %c0_2 = arith.constant 0 : index
    %2 = vector.load %arg2[%c0_1, %c0_2] : memref<1024x128xf32, #tpu.memory_space<vmem>>, vector<1024x128xf32>
    %3 = arith.truncf %2 : vector<1024x128xf32> to vector<1024x128xbf16>
    %cst = arith.constant dense<0.000000e+00> : vector<2x128xf32>
    %4 = tpu.matmul %1, %3, %cst {dimension_numbers = #tpu.dot_dimension_numbers<[1], [0], [0], [1], [0, 0, 1, 1], [], []>} : vector<2x1024xbf16>, vector<1024x128xbf16>, vector<2x128xf32> -> vector<2x128xf32>
    %c0_3 = arith.constant 0 : index
    %c0_4 = arith.constant 0 : index
    %5 = vector.load %arg3[%c0_3, %c0_4] : memref<1x128xf32, #tpu.memory_space<vmem>>, vector<1x128xf32>
    %6 = vector.broadcast %5 : vector<1x128xf32> to vector<2x128xf32>
    %7 = arith.addf %4, %6 : vector<2x128xf32>
    %c0_5 = arith.constant 0 : index
    %c0_6 = arith.constant 0 : index
    %8 = vector.load %arg6[%c0_5, %c0_6] : memref<2x128xf32, #tpu.memory_space<vmem>>, vector<2x128xf32>
    tpu.vector_store %arg6[%c0_5, %c0_6], %7 {strides = array<i32>} : memref<2x128xf32, #tpu.memory_space<vmem>>, vector<2x128xf32>,
    %c0_7 = arith.constant 0 : index
    %c0_8 = arith.constant 0 : index
    %9 = vector.load %arg4[%c0_7, %c0_8] : memref<2x128xf32, #tpu.memory_space<vmem>>, vector<2x128xf32>
    %10 = math.absf %7 : vector<2x128xf32>
    %cst_9 = arith.constant 0.000000e+00 : f32
    %11 = vector.broadcast %cst_9 : f32 to vector<2x128xf32>
    %12 = arith.subf %11, %10 : vector<2x128xf32>
    %13 = math.exp %12 : vector<2x128xf32>
    %cst_10 = arith.constant 1.000000e+00 : f32
    %14 = vector.broadcast %cst_10 : f32 to vector<2x128xf32>
    %15 = arith.addf %14, %13 : vector<2x128xf32>
    %16 = arith.divf %13, %15 : vector<2x128xf32>
    %17 = math.log %15 : vector<2x128xf32>
    %18 = arith.mulf %12, %16 : vector<2x128xf32>
    %19 = arith.subf %17, %18 : vector<2x128xf32>
    %cst_11 = arith.constant 0.000000e+00 : f32
    %20 = vector.broadcast %cst_11 : f32 to vector<2x128xf32>
    %21 = arith.cmpf oge, %7, %20 : vector<2x128xf32>
    %cst_12 = arith.constant 1.000000e+00 : f32
    %22 = vector.broadcast %cst_12 : f32 to vector<2x128xf32>
    %23 = arith.subf %22, %16 : vector<2x128xf32>
    %24 = arith.select %21, %23, %16 : vector<2x128xi1>, vector<2x128xf32>
    %25 = arith.cmpf olt, %9, %24 : vector<2x128xf32>
    %26 = arith.extui %25 : vector<2x128xi1> to vector<2x128xi32>
    %27 = arith.sitofp %26 : vector<2x128xi32> to vector<2x128xf32>
    %c0_13 = arith.constant 0 : index
    %c0_14 = arith.constant 0 : index
    %28 = vector.load %arg5[%c0_13, %c0_14] : memref<2x128xf32, #tpu.memory_space<vmem>>, vector<2x128xf32>
    tpu.vector_store %arg5[%c0_13, %c0_14], %27 {strides = array<i32>} : memref<2x128xf32, #tpu.memory_space<vmem>>, vector<2x128xf32>,
    %cst_15 = arith.constant 1.000000e+00 : f32
    %29 = vector.broadcast %cst_15 : f32 to vector<1x128xf32>
    %cst_16 = arith.constant dense<0.000000e+00> : vector<1x2xf32>
    %30 = tpu.matmul %29, %19, %cst_16 {dimension_numbers = #tpu.dot_dimension_numbers<[1], [1], [0], [0], [0, 0, 1, 0], [], []>} : vector<1x128xf32>, vector<2x128xf32>, vector<1x2xf32> -> vector<1x2xf32>
    %c0_17 = arith.constant 0 : index
    %c0_18 = arith.constant 0 : index
    %31 = vector.load %arg7[%c0_17, %c0_18] : memref<1x2xf32, #tpu.memory_space<vmem>>, vector<1x2xf32>
    tpu.vector_store %arg7[%c0_17, %c0_18], %30 {strides = array<i32>} : memref<1x2xf32, #tpu.memory_space<vmem>>, vector<1x2xf32>,
    return
  }
  func.func @transform_0(%arg0: i32) -> (i32, i32) {
    %c0_i32 = arith.constant 0 : i32
    %c0_i32_0 = arith.constant 0 : i32
    return %arg0, %c0_i32 : i32, i32
  }
  func.func @transform_1(%arg0: i32) -> (i32, i32) {
    %c0_i32 = arith.constant 0 : i32
    %c0_i32_0 = arith.constant 0 : i32
    %c0_i32_1 = arith.constant 0 : i32
    return %c0_i32, %c0_i32_0 : i32, i32
  }
  func.func @transform_2(%arg0: i32) -> (i32, i32) {
    %c0_i32 = arith.constant 0 : i32
    %c0_i32_0 = arith.constant 0 : i32
    %c0_i32_1 = arith.constant 0 : i32
    return %c0_i32, %c0_i32_0 : i32, i32
  }
  func.func @transform_3(%arg0: i32) -> (i32, i32) {
    %c0_i32 = arith.constant 0 : i32
    %c0_i32_0 = arith.constant 0 : i32
    return %arg0, %c0_i32 : i32, i32
  }
  func.func @transform_4(%arg0: i32) -> (i32, i32) {
    %c0_i32 = arith.constant 0 : i32
    %c0_i32_0 = arith.constant 0 : i32
    return %arg0, %c0_i32 : i32, i32
  }
  func.func @transform_5(%arg0: i32) -> (i32, i32) {
    %c0_i32 = arith.constant 0 : i32
    %c0_i32_0 = arith.constant 0 : i32
    return %arg0, %c0_i32 : i32, i32
  }
  func.func @transform_6(%arg0: i32) -> (i32, i32) {
    %c0_i32 = arith.constant 0 : i32
    %c0_i32_0 = arith.constant 0 : i32
    return %c0_i32, %arg0 : i32, i32
  }
}

</mosaic_0001>

<bundles_post_ra>
// kernel: tpu_custom_call.1
= control target key start
LH: loop header
LB: loop body
LE: loop exit
PB: predicated region body
PF: predicated region fallthrough
CT: control target
= control target key end

     0   :  { %12 = vsyncpa [#allocation3], 0  ;;  %s906_s0 = inlined_call_operand.hbm [shape: f32[2,1024], index: 0, kind: input, shape index: {}]   ;;  %s907_s1 = inlined_call_operand.hbm [shape: f32[1024,128], index: 1, kind: input, shape index: {}]   ;;  %s908_s2 = inlined_call_operand.vmem [shape: f32[1,128], index: 2, kind: input, shape index: {}]   ;;  %s909_s3 = inlined_call_operand.vmem [shape: f32[2,128], index: 3, kind: input, shape index: {}]   ;;  %s910_s4 = inlined_call_operand.hbm [shape: f32[2,128], index: 4, kind: output, shape index: {0}]   ;;  %s911_s5 = inlined_call_operand.hbm [shape: f32[2,128], index: 5, kind: output, shape index: {1}]   ;;  %s912_s6 = inlined_call_operand.hbm [shape: f32[1,2], index: 6, kind: output, shape index: {2}]  }
   0x1   :  { %13 = vsyncpa [#allocation6], 0 }
   0x2   :  { %14 = vsyncpa [#allocation4], 0 }
   0x3   :  { %15 = vsyncpa [#allocation9], 0  ;;  %s821_s21 = smov [#allocation2]   ;;  %s822_s23 = smov [#allocation5]  }
   0x4   :  { %s22_s22 = sshll.u32 %s821_s21, 4  ;;  %s31_s24 = sshll.u32 %s822_s23, 4  ;;  %s23_s22 = int_to_ptr.vmem [resolvable:$true] %s22_s22  ;;  %s32_s24 = int_to_ptr.vmem [resolvable:$true] %s31_s24 }
   0x5   :  { %s721_s25 = scalar_lea.vmem %s23_s22, 256  ;;  %p726_p1 = scmp.lt.s32.totalorder %s23_s22, %s23_s22 }
   0x6   :  { %p722_p0 = scmp.ne.s32.totalorder %s23_s22, %s721_s25  ;;  %p727_p2 = scmp.lt.s32.totalorder %s721_s25, %s721_s25 }
   0x8   :  { %p728_p3 = por %p727_p2, %p726_p1 }
   0xa   :  { %p729_p4 = pnand %p728_p3, %p722_p0 }
   0xc   :  { %732 = shalt.err (!%p729_p4)
}
   0xd   :  { %25 = dma.hbm_to_vmem [thread:$0]  %s906_s0, 256, %s23_s22, [#allocation3]  }
   0xe   :  { %s741_s28 = scalar_lea.vmem %s32_s24, 16384  ;;  %p746_p6 = scmp.lt.s32.totalorder %s32_s24, %s32_s24 }
   0xf   :  { %p742_p5 = scmp.ne.s32.totalorder %s32_s24, %s741_s28  ;;  %p747_p7 = scmp.lt.s32.totalorder %s741_s28, %s741_s28 }
  0x11   :  { %p748_p8 = por %p747_p7, %p746_p6 }
  0x13   :  { %p749_p9 = pnand %p748_p8, %p742_p5 }
  0x15   :  { %752 = shalt.err (!%p749_p9)
}
  0x16   :  { %s823_s29 = smov 128   ;;  %s824_s30 = smov 8  }
  0x17   :  { %37 = dma.hbm_to_vmem [thread:$0]  %s907_s1, 16384, %s32_s24, [#allocation6], %s823_s29, %s823_s29, %s824_s30  }
  0x18   :  { %813 = dma.done.wait [#allocation3], 256  }
  0x19   :  { %814 = vsyncadd [#allocation3], 4294967040 }
  0x1a   :  { %815 = dma.done.wait [#allocation6], 16384  }
  0x1b   :  { %816 = vsyncadd [#allocation6], 4294950912  ;;  %v133_v0 = vld [vmem:[#allocation5 + $0xf0] sm:$0xff]  ;;  %v134_v1 = vld [vmem:[#allocation5 + $0xf8] sm:$0xff]  ;;  %v825_v47 = vmov 1983009808   ;;  %v57_v49 = vlaneseq }
  0x1c   :  { %v165_v2 = vld [vmem:[#allocation5 + $0x1f0] sm:$0xff]  ;;  %v246_v3 = vpack.c.bf16 %v134_v1, %v133_v0  ;;  %v166_v4 = vld [vmem:[#allocation5 + $0x1f8] sm:$0xff]  ;;  %v131_v11 = vld [vmem:[#allocation5 + $0xe0] sm:$0xff]  ;;  %v55_v48 = vunpack.c.l.s4 %v825_v47  ;;  %vm827_vm0 = vmmov 0   ;;  %s829_s10 = smov [#allocation8]   ;;  %s830_s12 = smov [#allocation7]  }
  0x1d   :  { %v117_v5 = vld [vmem:[#allocation5 + $0x70] sm:$0xff]  ;;  %v118_v6 = vld [vmem:[#allocation5 + $0x78] sm:$0xff]  ;;  %v262_v7 = vpack.c.bf16 %v166_v4, %v165_v2  ;;  %v132_v13 = vld [vmem:[#allocation5 + $0xe8] sm:$0xff]  ;;  %v58_v0 = vshrl.u32 %v57_v49, 7  ;;  %s570_s11 = sshll.u32 %s829_s10, 4  ;;  %s560_s13 = sshll.u32 %s830_s12, 4  ;;  %s571_s11 = int_to_ptr.vmem [resolvable:$true] %s570_s11  ;;  %s561_s13 = int_to_ptr.vmem [resolvable:$true] %s560_s13 }
  0x1e   :  { %v238_v8 = vpack.c.bf16 %v118_v6, %v117_v5  ;;  %v149_v9 = vld [vmem:[#allocation5 + $0x170] sm:$0xff]  ;;  %v150_v10 = vld [vmem:[#allocation5 + $0x178] sm:$0xff]  ;;  %599 = vmatprep.subr.bf16.mxu0 %v246_v3  ;;  %v163_v14 = vld [vmem:[#allocation5 + $0x1e0] sm:$0xff]  ;;  %v245_v16 = vpack.c.bf16 %v132_v13, %v131_v11  ;;  %v56_v63 = vunpack.c.0.s8 %v55_v48  ;;  %s753_s14 = scalar_lea.vmem %s571_s11, 32  ;;  %p758_p11 = scmp.lt.s32.totalorder %s571_s11, %s571_s11 }
  0x1f   :  { %v254_v12 = vpack.c.bf16 %v150_v10, %v149_v9  ;;  %v164_v15 = vld [vmem:[#allocation5 + $0x1e8] sm:$0xff]  ;;  %621 = vmatprep.subr.bf16.mxu1 %v262_v7  ;;  %v115_v18 = vld [vmem:[#allocation5 + $0x60] sm:$0xff]  ;;  %v129_v23 = vld [vmem:[#allocation5 + $0xd0] sm:$0xff]  ;;  %p754_p10 = scmp.ne.s32.totalorder %s571_s11, %s753_s14  ;;  %p759_p12 = scmp.lt.s32.totalorder %s753_s14, %s753_s14 }
  0x20   :  { %600 = vmatpush3.bf16.msra.mxu0 %v238_v8  ;;  %v261_v17 = vpack.c.bf16 %v164_v15, %v163_v14  ;;  %v116_v19 = vld [vmem:[#allocation5 + $0x68] sm:$0xff]  ;;  %v147_v20 = vld [vmem:[#allocation5 + $0x160] sm:$0xff]  ;;  %v130_v24 = vld [vmem:[#allocation5 + $0xd8] sm:$0xff]  ;;  %v873_v13 = vsub.s32 %v56_v63, %v58_v0 }
  0x21   :  { %622 = vmatpush3.bf16.msra.mxu1 %v254_v12  ;;  %v237_v21 = vpack.c.bf16 %v116_v19, %v115_v18  ;;  %v148_v22 = vld [vmem:[#allocation5 + $0x168] sm:$0xff]  ;;  %601 = vmatprep.subr.bf16.mxu0 %v245_v16  ;;  %v244_v26 = vpack.c.bf16 %v130_v24, %v129_v23  ;;  %v161_v27 = vld [vmem:[#allocation5 + $0x1d0] sm:$0xff]  ;;  %v162_v28 = vld [vmem:[#allocation5 + $0x1d8] sm:$0xff]  ;;  %p760_p13 = por %p759_p12, %p758_p11 }
  0x22   :  { %623 = vmatprep.subr.bf16.mxu1 %v261_v17  ;;  %v253_v25 = vpack.c.bf16 %v148_v22, %v147_v20  ;;  %v113_v29 = vld [vmem:[#allocation5 + $0x50] sm:$0xff]  ;;  %v260_v30 = vpack.c.bf16 %v162_v28, %v161_v27  ;;  %v114_v31 = vld [vmem:[#allocation5 + $0x58] sm:$0xff]  ;;  %v127_v35 = vld [vmem:[#allocation5 + $0xc0] sm:$0xff] }
  0x23   :  { %v145_v32 = vld [vmem:[#allocation5 + $0x150] sm:$0xff]  ;;  %v146_v33 = vld [vmem:[#allocation5 + $0x158] sm:$0xff]  ;;  %v236_v34 = vpack.c.bf16 %v114_v31, %v113_v29  ;;  %v128_v36 = vld [vmem:[#allocation5 + $0xc8] sm:$0xff]  ;;  %p761_p0 = pnand %p760_p13, %p754_p10 }
  0x24   :  { %602 = vmatpush3.bf16.msra.mxu0 %v237_v21  ;;  %v159_v37 = vld [vmem:[#allocation5 + $0x1c0] sm:$0xff]  ;;  %v252_v38 = vpack.c.bf16 %v146_v33, %v145_v32  ;;  %v243_v39 = vpack.c.bf16 %v128_v36, %v127_v35  ;;  %v160_v40 = vld [vmem:[#allocation5 + $0x1c8] sm:$0xff]  ;;  %v125_v46 = vld [vmem:[#allocation5 + $0xb0] sm:$0xff] }
  0x25   :  { %624 = vmatpush3.bf16.msra.mxu1 %v253_v25  ;;  %603 = vmatprep.subr.bf16.mxu0 %v244_v26  ;;  %v111_v41 = vld [vmem:[#allocation5 + $0x40] sm:$0xff]  ;;  %v112_v42 = vld [vmem:[#allocation5 + $0x48] sm:$0xff]  ;;  %v259_v43 = vpack.c.bf16 %v160_v40, %v159_v37  ;;  %v126_v50 = vld [vmem:[#allocation5 + $0xb8] sm:$0xff] }
  0x26   :  { %625 = vmatprep.subr.bf16.mxu1 %v260_v30  ;;  %v143_v44 = vld [vmem:[#allocation5 + $0x140] sm:$0xff]  ;;  %v144_v45 = vld [vmem:[#allocation5 + $0x148] sm:$0xff]  ;;  %v157_v51 = vld [vmem:[#allocation5 + $0x1b0] sm:$0xff]  ;;  %v235_v53 = vpack.c.bf16 %v112_v42, %v111_v41  ;;  %v242_v55 = vpack.c.bf16 %v126_v50, %v125_v46 }
  0x27   :  { %v158_v52 = vld [vmem:[#allocation5 + $0x1b8] sm:$0xff]  ;;  %v251_v54 = vpack.c.bf16 %v144_v45, %v143_v44  ;;  %v109_v56 = vld [vmem:[#allocation5 + $0x30] sm:$0xff]  ;;  %v123_v61 = vld [vmem:[#allocation5 + $0xa0] sm:$0xff] }
  0x28   :  { %604 = vmatpush3.bf16.msra.mxu0 %v236_v34  ;;  %v110_v57 = vld [vmem:[#allocation5 + $0x38] sm:$0xff]  ;;  %v141_v58 = vld [vmem:[#allocation5 + $0x130] sm:$0xff]  ;;  %v258_v59 = vpack.c.bf16 %v158_v52, %v157_v51  ;;  %v124_v62 = vld [vmem:[#allocation5 + $0xa8] sm:$0xff] }
  0x29   :  { %626 = vmatpush3.bf16.msra.mxu1 %v252_v38  ;;  %605 = vmatprep.subr.bf16.mxu0 %v243_v39  ;;  %v142_v60 = vld [vmem:[#allocation5 + $0x138] sm:$0xff]  ;;  %v155_v1 = vld [vmem:[#allocation5 + $0x1a0] sm:$0xff]  ;;  %v156_v2 = vld [vmem:[#allocation5 + $0x1a8] sm:$0xff]  ;;  %v234_v3 = vpack.c.bf16 %v110_v57, %v109_v56  ;;  %v241_v5 = vpack.c.bf16 %v124_v62, %v123_v61 }
  0x2a   :  { %627 = vmatprep.subr.bf16.mxu1 %v259_v43  ;;  %v250_v4 = vpack.c.bf16 %v142_v60, %v141_v58  ;;  %v107_v6 = vld [vmem:[#allocation5 + $0x20] sm:$0xff]  ;;  %v108_v7 = vld [vmem:[#allocation5 + $0x28] sm:$0xff]  ;;  %v257_v9 = vpack.c.bf16 %v156_v2, %v155_v1  ;;  %v121_v11 = vld [vmem:[#allocation5 + $0x90] sm:$0xff] }
  0x2b   :  { %v139_v8 = vld [vmem:[#allocation5 + $0x120] sm:$0xff]  ;;  %v140_v10 = vld [vmem:[#allocation5 + $0x128] sm:$0xff]  ;;  %v122_v12 = vld [vmem:[#allocation5 + $0x98] sm:$0xff]  ;;  %v233_v16 = vpack.c.bf16 %v108_v7, %v107_v6 }
  0x2c   :  { %606 = vmatpush3.bf16.msra.mxu0 %v235_v53  ;;  %v153_v14 = vld [vmem:[#allocation5 + $0x190] sm:$0xff]  ;;  %v154_v15 = vld [vmem:[#allocation5 + $0x198] sm:$0xff]  ;;  %v249_v18 = vpack.c.bf16 %v140_v10, %v139_v8  ;;  %v240_v19 = vpack.c.bf16 %v122_v12, %v121_v11  ;;  %v119_v25 = vld [vmem:[#allocation5 + $0x80] sm:$0xff] }
  0x2d   :  { %628 = vmatpush3.bf16.msra.mxu1 %v251_v54  ;;  %607 = vmatprep.subr.bf16.mxu0 %v242_v55  ;;  %v105_v17 = vld [vmem:[#allocation5 + $0x10] sm:$0xff]  ;;  %v106_v20 = vld [vmem:[#allocation5 + $0x18] sm:$0xff]  ;;  %v256_v23 = vpack.c.bf16 %v154_v15, %v153_v14  ;;  %v120_v26 = vld [vmem:[#allocation5 + $0x88] sm:$0xff] }
  0x2e   :  { %629 = vmatprep.subr.bf16.mxu1 %v258_v59  ;;  %v137_v21 = vld [vmem:[#allocation5 + $0x110] sm:$0xff]  ;;  %v138_v24 = vld [vmem:[#allocation5 + $0x118] sm:$0xff]  ;;  %v151_v29 = vld [vmem:[#allocation5 + $0x180] sm:$0xff]  ;;  %v232_v31 = vpack.c.bf16 %v106_v20, %v105_v17  ;;  %v239_v35 = vpack.c.bf16 %v120_v26, %v119_v25 }
  0x2f   :  { %v49_v22 = vld [vmem:[#allocation2] sm:$0xff]  ;;  %v152_v30 = vld [vmem:[#allocation5 + $0x188] sm:$0xff]  ;;  %v248_v34 = vpack.c.bf16 %v138_v24, %v137_v21  ;;  %v103_v36 = vld [vmem:[#allocation5] sm:$0xff] }
  0x30   :  { %608 = vmatpush3.bf16.msra.mxu0 %v234_v3  ;;  %v60_v27 = vrot.slane %v49_v22, %v873_v13  ;;  %v53_v28 = vcombine.high %v49_v22, %v49_v22  ;;  %v104_v37 = vld [vmem:[#allocation5 + $0x8] sm:$0xff]  ;;  %v135_v38 = vld [vmem:[#allocation5 + $0x100] sm:$0xff]  ;;  %v255_v39 = vpack.c.bf16 %v152_v30, %v151_v29  ;;  %v197_v43 = vld [vmem:[#allocation5 + $0x2f0] sm:$0xff] }
  0x31   :  { %630 = vmatpush3.bf16.msra.mxu1 %v250_v4  ;;  %609 = vmatprep.subr.bf16.mxu0 %v241_v5  ;;  %v136_v40 = vld [vmem:[#allocation5 + $0x108] sm:$0xff]  ;;  %v198_v44 = vld [vmem:[#allocation5 + $0x2f8] sm:$0xff]  ;;  %v229_v45 = vld [vmem:[#allocation5 + $0x3f0] sm:$0xff]  ;;  %v231_v47 = vpack.c.bf16 %v104_v37, %v103_v36 }
  0x32   :  { %631 = vmatprep.subr.bf16.mxu1 %v257_v9  ;;  %v68_v32 = vcombine.high %v60_v27, %v60_v27  ;;  %v67_v33 = vrot.slane %v53_v28, %v873_v13  ;;  %v230_v46 = vld [vmem:[#allocation5 + $0x3f8] sm:$0xff]  ;;  %v247_v49 = vpack.c.bf16 %v136_v40, %v135_v38  ;;  %v278_v50 = vpack.c.bf16 %v198_v44, %v197_v43  ;;  %v181_v51 = vld [vmem:[#allocation5 + $0x270] sm:$0xff]  ;;  %v195_v56 = vld [vmem:[#allocation5 + $0x2e0] sm:$0xff] }
  0x33   :  { %v182_v52 = vld [vmem:[#allocation5 + $0x278] sm:$0xff]  ;;  %v213_v53 = vld [vmem:[#allocation5 + $0x370] sm:$0xff]  ;;  %v294_v54 = vpack.c.bf16 %v230_v46, %v229_v45  ;;  %v196_v57 = vld [vmem:[#allocation5 + $0x2e8] sm:$0xff]  ;;  %v95_v58 = vpack.c.bf16 %v60_v27, %v60_v27 }
  0x34   :  { %610 = vmatpush3.bf16.msra.mxu0 %v233_v16  ;;  %v96_v41 = vpack.c.bf16 %v68_v32, %v68_v32  ;;  %v69_v42 = vcombine.high %v67_v33, %v67_v33  ;;  %v214_v55 = vld [vmem:[#allocation5 + $0x378] sm:$0xff]  ;;  %v227_v59 = vld [vmem:[#allocation5 + $0x3e0] sm:$0xff]  ;;  %v228_v60 = vld [vmem:[#allocation5 + $0x3e8] sm:$0xff]  ;;  %v97_v61 = vpack.c.bf16 %v67_v33, %v67_v33  ;;  %v270_v62 = vpack.c.bf16 %v182_v52, %v181_v51 }
  0x35   :  { %632 = vmatpush3.bf16.msra.mxu1 %v249_v18  ;;  %611 = vmatprep.subr.bf16.mxu0 %v240_v19  ;;  %v286_v63 = vpack.c.bf16 %v214_v55, %v213_v53  ;;  %v277_v0 = vpack.c.bf16 %v196_v57, %v195_v56  ;;  %v179_v1 = vld [vmem:[#allocation5 + $0x260] sm:$0xff]  ;;  %v180_v2 = vld [vmem:[#allocation5 + $0x268] sm:$0xff]  ;;  %v293_v4 = vpack.c.bf16 %v228_v60, %v227_v59  ;;  %v193_v6 = vld [vmem:[#allocation5 + $0x2d0] sm:$0xff] }
  0x36   :  { %633 = vmatprep.subr.bf16.mxu1 %v256_v23  ;;  %334 = vmatprep.mubr.bf16.mxu0 %v96_v41  ;;  %v98_v48 = vpack.c.bf16 %v69_v42, %v69_v42  ;;  %v211_v3 = vld [vmem:[#allocation5 + $0x360] sm:$0xff]  ;;  %v212_v5 = vld [vmem:[#allocation5 + $0x368] sm:$0xff]  ;;  %v194_v7 = vld [vmem:[#allocation5 + $0x2d8] sm:$0xff]  ;;  %v269_v10 = vpack.c.bf16 %v180_v2, %v179_v1 }
  0x37   :  { %v225_v8 = vld [vmem:[#allocation5 + $0x3d0] sm:$0xff]  ;;  %v226_v9 = vld [vmem:[#allocation5 + $0x3d8] sm:$0xff]  ;;  %v285_v11 = vpack.c.bf16 %v212_v5, %v211_v3  ;;  %v276_v12 = vpack.c.bf16 %v194_v7, %v193_v6  ;;  %v191_v19 = vld [vmem:[#allocation5 + $0x2c0] sm:$0xff] }
  0x38   :  { %612 = vmatpush3.bf16.msra.mxu0 %v232_v31  ;;  %374 = vmatprep.mubr.bf16.mxu1 %v98_v48  ;;  %v177_v14 = vld [vmem:[#allocation5 + $0x250] sm:$0xff]  ;;  %v178_v15 = vld [vmem:[#allocation5 + $0x258] sm:$0xff]  ;;  %v292_v17 = vpack.c.bf16 %v226_v9, %v225_v8  ;;  %v192_v20 = vld [vmem:[#allocation5 + $0x2c8] sm:$0xff] }
  0x39   :  { %634 = vmatpush3.bf16.msra.mxu1 %v248_v34  ;;  %613 = vmatprep.subr.bf16.mxu0 %v239_v35  ;;  %v209_v16 = vld [vmem:[#allocation5 + $0x350] sm:$0xff]  ;;  %v210_v18 = vld [vmem:[#allocation5 + $0x358] sm:$0xff]  ;;  %v223_v21 = vld [vmem:[#allocation5 + $0x3c0] sm:$0xff]  ;;  %v268_v23 = vpack.c.bf16 %v178_v15, %v177_v14  ;;  %v275_v25 = vpack.c.bf16 %v192_v20, %v191_v19 }
  0x3a   :  { %635 = vmatprep.subr.bf16.mxu1 %v255_v39  ;;  %v224_v22 = vld [vmem:[#allocation5 + $0x3c8] sm:$0xff]  ;;  %v284_v24 = vpack.c.bf16 %v210_v18, %v209_v16  ;;  %v175_v26 = vld [vmem:[#allocation5 + $0x240] sm:$0xff]  ;;  %v189_v31 = vld [vmem:[#allocation5 + $0x2b0] sm:$0xff] }
  0x3b   :  { %v176_v27 = vld [vmem:[#allocation5 + $0x248] sm:$0xff]  ;;  %v207_v28 = vld [vmem:[#allocation5 + $0x340] sm:$0xff]  ;;  %v291_v29 = vpack.c.bf16 %v224_v22, %v223_v21  ;;  %v190_v32 = vld [vmem:[#allocation5 + $0x2b8] sm:$0xff] }
  0x3c   :  { %614 = vmatpush3.bf16.msra.mxu0 %v231_v47  ;;  %v208_v30 = vld [vmem:[#allocation5 + $0x348] sm:$0xff]  ;;  %v221_v33 = vld [vmem:[#allocation5 + $0x3b0] sm:$0xff]  ;;  %v222_v34 = vld [vmem:[#allocation5 + $0x3b8] sm:$0xff]  ;;  %v267_v36 = vpack.c.bf16 %v176_v27, %v175_v26  ;;  %v274_v40 = vpack.c.bf16 %v190_v32, %v189_v31  ;;  %v826_v27 = vmov 0.0  }
  0x3d   :  { %636 = vmatpush3.bf16.msra.mxu1 %v247_v49  ;;  %643 = vmatprep.subr.bf16.mxu0 %v278_v50  ;;  %v50_v35 = vld [vmem:[#allocation2 + $0x8] sm:$0xff]  ;;  %v283_v39 = vpack.c.bf16 %v208_v30, %v207_v28  ;;  %v173_v41 = vld [vmem:[#allocation5 + $0x230] sm:$0xff]  ;;  %v290_v44 = vpack.c.bf16 %v222_v34, %v221_v33  ;;  %v187_v46 = vld [vmem:[#allocation5 + $0x2a0] sm:$0xff] }
  0x3e   :  { %665 = vmatprep.subr.bf16.mxu1 %v294_v54  ;;  %v878_v37 = vrot.slane %v50_v35, %v873_v13  ;;  %v70_v38 = vcombine.high %v50_v35, %v50_v35  ;;  %v174_v42 = vld [vmem:[#allocation5 + $0x238] sm:$0xff]  ;;  %v205_v43 = vld [vmem:[#allocation5 + $0x330] sm:$0xff]  ;;  %v188_v47 = vld [vmem:[#allocation5 + $0x2a8] sm:$0xff] }
  0x3f   :  { %335 = vmatmul.mubr.bf16.vlgmr.msra.gmra.mxu0 %v95_v58  ;;  %v206_v45 = vld [vmem:[#allocation5 + $0x338] sm:$0xff]  ;;  %v219_v50 = vld [vmem:[#allocation5 + $0x3a0] sm:$0xff]  ;;  %v220_v51 = vld [vmem:[#allocation5 + $0x3a8] sm:$0xff]  ;;  %v266_v52 = vpack.c.bf16 %v174_v42, %v173_v41  ;;  %v273_v56 = vpack.c.bf16 %v188_v47, %v187_v46 }
  0x40   :  { %375 = vmatmul.mubr.bf16.vlgmr.msra.gmra.mxu1 %v97_v61  ;;  %644 = vmatpush3.bf16.msra.mxu0 %v270_v62  ;;  %v85_v48 = vcombine.high %v878_v37, %v878_v37  ;;  %v883_v49 = vrot.slane %v70_v38, %v873_v13  ;;  %v282_v55 = vpack.c.bf16 %v206_v45, %v205_v43  ;;  %v171_v57 = vld [vmem:[#allocation5 + $0x220] sm:$0xff]  ;;  %v172_v58 = vld [vmem:[#allocation5 + $0x228] sm:$0xff]  ;;  %v185_v13 = vld [vmem:[#allocation5 + $0x290] sm:$0xff] }
  0x41   :  { %666 = vmatpush3.bf16.msra.mxu1 %v286_v63  ;;  %645 = vmatprep.subr.bf16.mxu0 %v277_v0  ;;  %v203_v59 = vld [vmem:[#allocation5 + $0x320] sm:$0xff]  ;;  %v289_v60 = vpack.c.bf16 %v220_v51, %v219_v50  ;;  %v204_v61 = vld [vmem:[#allocation5 + $0x328] sm:$0xff]  ;;  %v186_v62 = vld [vmem:[#allocation5 + $0x298] sm:$0xff]  ;;  %v265_v2 = vpack.c.bf16 %v172_v58, %v171_v57 }
  0x42   :  { %667 = vmatprep.subr.bf16.mxu1 %v293_v4  ;;  %v100_v53 = vpack.c.bf16 %v85_v48, %v85_v48  ;;  %v86_v54 = vcombine.high %v883_v49, %v883_v49  ;;  %v217_v0 = vld [vmem:[#allocation5 + $0x390] sm:$0xff]  ;;  %v218_v1 = vld [vmem:[#allocation5 + $0x398] sm:$0xff]  ;;  %v281_v3 = vpack.c.bf16 %v204_v61, %v203_v59  ;;  %v272_v4 = vpack.c.bf16 %v186_v62, %v185_v13  ;;  %v216_v14 = vld [vmem:[#allocation5 + $0x388] sm:$0xff] }
  0x43   :  { %v169_v5 = vld [vmem:[#allocation5 + $0x210] sm:$0xff]  ;;  %v170_v6 = vld [vmem:[#allocation5 + $0x218] sm:$0xff]  ;;  %v288_v8 = vpack.c.bf16 %v218_v1, %v217_v0  ;;  %v167_v18 = vld [vmem:[#allocation5 + $0x200] sm:$0xff]  ;;  %v101_v26 = vpack.c.bf16 %v883_v49, %v883_v49 }
  0x44   :  { %646 = vmatpush3.bf16.msra.mxu0 %v269_v10  ;;  %414 = vmatprep.mubr.bf16.mxu0 %v100_v53  ;;  %v102_v63 = vpack.c.bf16 %v86_v54, %v86_v54  ;;  %v201_v7 = vld [vmem:[#allocation5 + $0x310] sm:$0xff]  ;;  %v202_v9 = vld [vmem:[#allocation5 + $0x318] sm:$0xff]  ;;  %v183_v10 = vld [vmem:[#allocation5 + $0x280] sm:$0xff]  ;;  %v264_v15 = vpack.c.bf16 %v170_v6, %v169_v5 }
  0x45   :  { %668 = vmatpush3.bf16.msra.mxu1 %v285_v11  ;;  %647 = vmatprep.subr.bf16.mxu0 %v276_v12  ;;  %v184_v11 = vld [vmem:[#allocation5 + $0x288] sm:$0xff]  ;;  %v215_v12 = vld [vmem:[#allocation5 + $0x380] sm:$0xff]  ;;  %v280_v16 = vpack.c.bf16 %v202_v9, %v201_v7  ;;  %v463_v62 = vld [vmem:[%s909_s3] sm:$0x3] }
  0x46   :  { %669 = vmatprep.subr.bf16.mxu1 %v292_v17  ;;  %454 = vmatprep.mubr.bf16.mxu1 %v102_v63  ;;  %v271_v17 = vpack.c.bf16 %v184_v11, %v183_v10  ;;  %v168_v19 = vld [vmem:[#allocation5 + $0x208] sm:$0xff]  ;;  %v287_v20 = vpack.c.bf16 %v216_v14, %v215_v12  ;;  %v199_v21 = vld [vmem:[#allocation5 + $0x300] sm:$0xff] }
  0x47   :  { %v200_v22 = vld [vmem:[#allocation5 + $0x308] sm:$0xff] }
  0x48   :  { %648 = vmatpush3.bf16.msra.mxu0 %v268_v23  ;;  %v263_v23 = vpack.c.bf16 %v168_v19, %v167_v18 }
  0x49   :  { %670 = vmatpush3.bf16.msra.mxu1 %v284_v24  ;;  %649 = vmatprep.subr.bf16.mxu0 %v275_v25  ;;  %v279_v24 = vpack.c.bf16 %v200_v22, %v199_v21  ;;  %v99_v25 = vpack.c.bf16 %v878_v37, %v878_v37  ;;  %v597_v37 = vld [vmem:[%s908_s2] ss:$0 sm:$0xff] }
  0x4a   :  { %671 = vmatprep.subr.bf16.mxu1 %v291_v29 }
  0x4c   :  { %650 = vmatpush3.bf16.msra.mxu0 %v267_v36 }
  0x4d   :  { %672 = vmatpush3.bf16.msra.mxu1 %v283_v39  ;;  %651 = vmatprep.subr.bf16.mxu0 %v274_v40 }
  0x4e   :  { %673 = vmatprep.subr.bf16.mxu1 %v290_v44 }
  0x50   :  { %652 = vmatpush3.bf16.msra.mxu0 %v266_v52 }
  0x51   :  { %674 = vmatpush3.bf16.msra.mxu1 %v282_v55  ;;  %653 = vmatprep.subr.bf16.mxu0 %v273_v56 }
  0x52   :  { %675 = vmatprep.subr.bf16.mxu1 %v289_v60 }
  0x54   :  { %654 = vmatpush3.bf16.msra.mxu0 %v265_v2 }
  0x55   :  { %676 = vmatpush3.bf16.msra.mxu1 %v281_v3  ;;  %655 = vmatprep.subr.bf16.mxu0 %v272_v4  ;;  %v828_v3 = vmov 1.0  }
  0x56   :  { %677 = vmatprep.subr.bf16.mxu1 %v288_v8 }
  0x58   :  { %656 = vmatpush3.bf16.msra.mxu0 %v264_v15 }
  0x59   :  { %678 = vmatpush3.bf16.msra.mxu1 %v280_v16  ;;  %657 = vmatprep.subr.bf16.mxu0 %v271_v17 }
  0x5a   :  { %679 = vmatprep.subr.bf16.mxu1 %v287_v20 }
  0x5c   :  { %658 = vmatpush3.bf16.msra.mxu0 %v263_v23 }
  0x5d   :  { %680 = vmatpush3.bf16.msra.mxu1 %v279_v24  ;;  %689 = vmatprep.subr.mxu0 %v826_v27 }
  0x5f   :  { %415 = vmatmul.mubr.bf16.vlgmr.msra.gmra.mxu0 %v99_v25 }
  0x60   :  { %455 = vmatmul.mubr.bf16.vlgmr.msra.gmra.mxu1 %v101_v26  ;;  %691 = vmatprep.mubr.msk.f32.mxu0 %vm827_vm0, %v826_v27 }
  0xff   :  { %v615_v28 = vpop.f32.mrf.mxu0 }
 0x100   :  { %v637_v29 = vpop.f32.mrf.mxu1 }
 0x101   :  { %v616_v30 = vpop.f32.mrf.mxu0 }
 0x102   :  { %v638_v31 = vpop.f32.mrf.mxu1  ;;  %v617_v36 = vadd.f32 %v616_v30, %v615_v28 }
 0x103   :  { %v618_v32 = vpop.f32.mrf.mxu0  ;;  %v639_v39 = vadd.f32 %v638_v31, %v637_v29 }
 0x104   :  { %v640_v33 = vpop.f32.mrf.mxu1  ;;  %v337_v38 = vadd.f32 %v617_v36, %v597_v37 }
 0x105   :  { %v619_v34 = vpop.f32.mrf.mxu0 }
 0x106   :  { %v641_v35 = vpop.f32.mrf.mxu1  ;;  %v377_v43 = vadd.f32 %v639_v39, %v337_v38 }
 0x11f   :  { %v659_v40 = vpop.f32.mrf.mxu0 }
 0x120   :  { %v681_v41 = vpop.f32.mrf.mxu1 }
 0x121   :  { %v660_v42 = vpop.f32.mrf.mxu0 }
 0x122   :  { %v661_v44 = vadd.f32 %v660_v42, %v659_v40  ;;  %v682_v45 = vpop.f32.mrf.mxu1 }
 0x123   :  { %v662_v46 = vpop.f32.mrf.mxu0  ;;  %v683_v48 = vadd.f32 %v682_v45, %v681_v41 }
 0x124   :  { %v417_v47 = vadd.f32 %v661_v44, %v377_v43  ;;  %v684_v49 = vpop.f32.mrf.mxu1 }
 0x125   :  { %v663_v50 = vpop.f32.mrf.mxu0 }
 0x126   :  { %v457_v51 = vadd.f32 %v683_v48, %v417_v47  ;;  %v685_v52 = vpop.f32.mrf.mxu1 }
 0x128   :  { %v464_v53 = vand.u32 2147483647, %v457_v51  ;;  %462 = vst [vmem:[#allocation8] sm:$0x3] %v457_v51  ;;  %vm475_vm1 = vcmp.ge.f32.partialorder %v457_v51, 0.0 }
 0x12a   :  { %v465_v54 = vsub.f32 0.0, %v464_v53 }
 0x12c   :  { %v466_v55 = vmul.f32 1.442695, %v465_v54 }
 0x12e   :  { %707 = vpow2.f32 %v466_v55 }
 0x13b   :  { %v708_v56 = vpop.eup %707 }
 0x13c   :  { %v468_v57 = vadd.f32 1.0, %v708_v56 }
 0x13e   :  { %709 = vrcp.f32 %v468_v57 }
 0x13f   :  { %711 = vlog2.f32 %v468_v57 }
 0x14b   :  { %v710_v58 = vpop.eup %709 }
 0x14c   :  { %v712_v59 = vpop.eup %711  ;;  %v470_v60 = vmul.f32 %v710_v58, %v708_v56 }
 0x14d   :  { %v472_v61 = vmul.f32 0.6931472, %v712_v59 }
 0x14e   :  { %v473_v13 = vmul.f32 %v470_v60, %v465_v54  ;;  %v476_v63 = vsub.f32 1.0, %v470_v60 }
 0x150   :  { %v474_v0 = vsub.f32 %v472_v61, %v473_v13  ;;  %v477_v1 = vsel %vm475_vm1, %v476_v63, %v470_v60 }
 0x151   :  { %vm478_vm2 = vcmp.lt.f32.partialorder %v463_v62, %v477_v1 }
 0x152   :  { %690 = vmatpush3.xpose.msra.mxu0 %v474_v0  ;;  %v598_v2 = vsel %vm478_vm2, 1.0, %v826_v27 }
 0x153   :  { %481 = vst [vmem:[#allocation7] sm:$0x3] %v598_v2 }
 0x155   :  { %692 = vmatmul.mubr.f32.vlgmr.msra.gmra.mxu0 %v828_v3 }
 0x156   :  { %764 = shalt.err (!%p761_p0)
}
 0x157   :  { %573 = dma.vmem_to_hbm [thread:$0]  %s571_s11, 32, %s911_s5, [#allocation9]  }
 0x158   :  { %s773_s16 = scalar_lea.vmem %s561_s13, 32  ;;  %p778_p2 = scmp.lt.s32.totalorder %s561_s13, %s561_s13 }
 0x159   :  { %p774_p1 = scmp.ne.s32.totalorder %s561_s13, %s773_s16  ;;  %p779_p3 = scmp.lt.s32.totalorder %s773_s16, %s773_s16 }
 0x15b   :  { %p780_p4 = por %p779_p3, %p778_p2 }
 0x15d   :  { %p781_p5 = pnand %p780_p4, %p774_p1 }
 0x15f   :  { %784 = shalt.err (!%p781_p5)
}
 0x160   :  { %563 = dma.vmem_to_hbm [thread:$0]  %s561_s13, 32, %s910_s4, [#allocation4]   ;;  %vm552_vm3 = vcmask 8192  }
 0x161   :  { %s831_s19 = smov [#allocation10]  }
 0x162   :  { %s580_s20 = sshll.u32 %s831_s19, 4  ;;  %s581_s20 = int_to_ptr.vmem [resolvable:$true] %s580_s20 }
 0x163   :  { %s793_s5 = scalar_lea.vmem %s581_s20, 16  ;;  %s797_s21 = scalar_lea.vmem %s581_s20, 32 }
 0x164   :  { %p794_p6 = scmp.ne.s32.totalorder %s581_s20, %s793_s5  ;;  %p798_p7 = scmp.lt.s32.totalorder %s581_s20, %s581_s20 }
 0x165   :  { %p799_p8 = scmp.lt.s32.totalorder %s797_s21, %s793_s5 }
 0x167   :  { %p800_p9 = por %p799_p8, %p798_p7 }
 0x169   :  { %p801_p10 = pnand %p800_p9, %p794_p6 }
 0x215   :  { %v548_v4 = vpop.f32.mrf.mxu0 }
 0x216   :  { %553 = vst.msk [vmem:[#allocation10] sm:$0x1] %vm552_vm3, %v548_v4 }
 0x217   :  { %v693_v5 = vpop.f32.mrf.mxu0 }
 0x218   :  { %804 = shalt.err (!%p801_p10)
}
 0x219   :  { %583 = dma.vmem_to_hbm [thread:$0]  %s581_s20, 16, %s912_s6, [#allocation9]  }
 0x21a   :  { %817 = dma.done.wait [#allocation4], 32  }
 0x21b   :  { %818 = vsyncadd [#allocation4], 4294967264 }
 0x21c   :  { %819 = dma.done.wait [#allocation9], 48  }
 0x21d   :  { %820 = vsyncadd [#allocation9], 4294967248 }
 0x21e   :  { %593 = vsyncpa [#allocation3], 1 }
 0x21f   :  { %594 = vsyncpa [#allocation6], 1 }
 0x220   :  { %595 = vsyncpa [#allocation4], 1 }
 0x221   :  { %596 = vsyncpa [#allocation9], 1 }

</bundles_post_ra>
